<compile_context>
chip_gen: v5e
topology: v5e:2x2
jax: 0.10.0
libtpu: 0.0.40
codegen_flags: <defaults>
</compile_context>

<pallas_src>
import functools

import jax
import jax.numpy as jnp
import numpy as np
from jax.experimental import pallas as pl
from jax.experimental.pallas import tpu as pltpu


# ----------------------------------------------------------------------------
# Pallas kernel: attention gate + global max pool + readout, fully fused.
# ----------------------------------------------------------------------------
def attention_readout_kernel(batch_ref, x_ref, attw_ref, row_ref, o_ref, *,
                             num_graphs, is_attention):
    """Fused AttentionClass forward for one small graph batch.

    batch_ref: (N, 1)     int32  graph id per node
    x_ref:     (N, D)     f32    node features
    attw_ref:  (1, D)     f32    attention weight (Linear(D, 1, bias=False).weight)
    row_ref:   (D, C_pad) f32    readout weight, transposed + lane-padded to 128
    o_ref:     (G, C_pad) f32    padded logits
    """
    x = x_ref[...]                                                  # (N, D)

    if is_attention:
        # score = x @ W_att^T  done as a lane reduce (D is the lane axis).
        score = jnp.sum(x * attw_ref[...], axis=-1, keepdims=True)  # (N, 1)
        gate = jax.nn.sigmoid(score)                                # (N, 1)
        x = (gate * x + x) * 0.5                                    # (N, D)

    # global_max_pool(x, batch): per-graph masked max over the node axis.
    batch = batch_ref[...]                                          # (N, 1)
    rows = []
    for g in range(num_graphs):                                     # static, tiny G
        mask = batch == g                                           # (N, 1)
        masked = jnp.where(mask, x, -jnp.inf)                       # (N, D)
        rows.append(jnp.max(masked, axis=0, keepdims=True))         # (1, D)
    hg = jnp.concatenate(rows, axis=0)                              # (G, D)

    # readout: hg @ W_readout^T (lane-padded) on the MXU.
    o_ref[...] = jnp.dot(hg, row_ref[...],
                         preferred_element_type=jnp.float32).astype(o_ref.dtype)


# ----------------------------------------------------------------------------
# Wrapper
# ----------------------------------------------------------------------------
def attention_class_forward(x, batch, att_w, readout_w, num_graphs,
                            is_attention=True):
    """Pallas forward.

    x:         (N, D) f32 node features (data.x)
    batch:     (N,)   int  graph id per node (data.batch)
    att_w:     (1, D) f32  attention.weight
    readout_w: (C, D) f32  readout_mlp.weight
    returns:   (num_graphs, C) logits
    """
    n, d = x.shape
    c = readout_w.shape[0]
    c_pad = max(128, ((c + 127) // 128) * 128)       # lane-dense output store

    # Host-side weight prep: transpose to (D, C) and zero-pad classes to 128.
    ro_w_t = jnp.zeros((d, c_pad), x.dtype).at[:, :c].set(readout_w.T)
    batch_2d = batch.reshape(n, 1).astype(jnp.int32)

    kernel = functools.partial(attention_readout_kernel,
                               num_graphs=num_graphs,
                               is_attention=is_attention)

    logits_pad = pl.pallas_call(
        kernel,
        out_shape=jax.ShapeDtypeStruct((num_graphs, c_pad), x.dtype),
        in_specs=[pl.BlockSpec(memory_space=pltpu.MemorySpace.VMEM)] * 4,
        out_specs=pl.BlockSpec(memory_space=pltpu.MemorySpace.VMEM),
    )(batch_2d, x, att_w, ro_w_t)

    return logits_pad[:, :c]


# ----------------------------------------------------------------------------
# Pure-JAX reference for correctness checking.
# ----------------------------------------------------------------------------
def attention_class_ref(x, batch, att_w, readout_w, num_graphs,
                        is_attention=True):
    if is_attention:
        gate = jax.nn.sigmoid(x @ att_w.T)           # (N, 1)
        x = (gate * x + x) / 2
    hg = jax.ops.segment_max(x, batch, num_segments=num_graphs)
    return hg @ readout_w.T


# ----------------------------------------------------------------------------
if __name__ == "__main__":
    key = jax.random.PRNGKey(0)
    kx, ka, kr = jax.random.split(key, 3)

    num_graphs = 2
    n_nodes = 16                          # uneven split: 6 nodes + 10 nodes
    in_dim = 128
    n_classes = 10

    x = jax.random.normal(kx, (n_nodes, in_dim), jnp.float32)
    batch = jnp.asarray([0] * 6 + [1] * 10, dtype=jnp.int32)
    att_w = 0.1 * jax.random.normal(ka, (1, in_dim), jnp.float32)          # Linear(D,1).weight
    readout_w = 0.1 * jax.random.normal(kr, (n_classes, in_dim), jnp.float32)  # Linear(D,C).weight

    out = attention_class_forward(x, batch, att_w, readout_w, num_graphs,
                                  is_attention=True)
    out = jax.block_until_ready(out)
    assert out.shape == (num_graphs, n_classes), out.shape

    ref = jax.block_until_ready(
        attention_class_ref(x, batch, att_w, readout_w, num_graphs,
                            is_attention=True))
    np.testing.assert_allclose(np.asarray(out), np.asarray(ref),
                               rtol=1e-3, atol=1e-3)

    # TODO(synk): only the default global_max_pool is implemented; other PyG
    # pooling choices (global_mean_pool / global_add_pool) are not reproduced.
    print("KERNEL_OK")
</pallas_src>

<mosaic_0001>
module attributes {stable_mosaic.version = 11 : i64} {
  func.func @attention_readout_kernel(%arg0: memref<16x1xi32, #tpu.memory_space<vmem>>, %arg1: memref<16x128xf32, #tpu.memory_space<vmem>>, %arg2: memref<1x128xf32, #tpu.memory_space<vmem>>, %arg3: memref<128x128xf32, #tpu.memory_space<vmem>>, %arg4: memref<2x128xf32, #tpu.memory_space<vmem>>) attributes {dimension_semantics = [], scalar_prefetch = 0 : i64, scratch_operands = 0 : i64, tpu.core_type = #tpu.core_type<tc>} {
    %c0 = arith.constant 0 : index
    %c0_0 = arith.constant 0 : index
    %0 = vector.load %arg1[%c0, %c0_0] : memref<16x128xf32, #tpu.memory_space<vmem>>, vector<16x128xf32>
    %c0_1 = arith.constant 0 : index
    %c0_2 = arith.constant 0 : index
    %1 = vector.load %arg2[%c0_1, %c0_2] : memref<1x128xf32, #tpu.memory_space<vmem>>, vector<1x128xf32>
    %2 = vector.broadcast %1 : vector<1x128xf32> to vector<16x128xf32>
    %3 = arith.mulf %0, %2 : vector<16x128xf32>
    %cst = arith.constant dense<0.000000e+00> : vector<16xf32>
    %4 = vector.multi_reduction <add>, %3, %cst [1] : vector<16x128xf32> to vector<16xf32>
    %5 = vector.shape_cast %4 : vector<16xf32> to vector<16x1xf32>
    %6 = arith.negf %5 : vector<16x1xf32>
    %7 = math.exp %6 : vector<16x1xf32>
    %cst_3 = arith.constant 1.000000e+00 : f32
    %8 = vector.broadcast %cst_3 : f32 to vector<16x1xf32>
    %9 = arith.addf %8, %7 : vector<16x1xf32>
    %10 = arith.divf %8, %9 : vector<16x1xf32>
    %11 = vector.broadcast %10 : vector<16x1xf32> to vector<16x128xf32>
    %12 = arith.mulf %11, %0 : vector<16x128xf32>
    %13 = arith.addf %12, %0 : vector<16x128xf32>
    %cst_4 = arith.constant 5.000000e-01 : f32
    %14 = vector.broadcast %cst_4 : f32 to vector<16x128xf32>
    %15 = arith.mulf %13, %14 : vector<16x128xf32>
    %c0_5 = arith.constant 0 : index
    %c0_6 = arith.constant 0 : index
    %16 = vector.load %arg0[%c0_5, %c0_6] : memref<16x1xi32, #tpu.memory_space<vmem>>, vector<16x1xi32>
    %c0_i32 = arith.constant 0 : i32
    %17 = vector.broadcast %c0_i32 : i32 to vector<16x1xi32>
    %18 = arith.cmpi eq, %16, %17 : vector<16x1xi32>
    %cst_7 = arith.constant 0xFF800000 : f32
    %19 = vector.shape_cast %18 : vector<16x1xi1> to vector<16x1xi1>
    %20 = vector.broadcast %19 : vector<16x1xi1> to vector<16x128xi1>
    %21 = vector.broadcast %cst_7 : f32 to vector<16x128xf32>
    %22 = arith.select %20, %15, %21 : vector<16x128xi1>, vector<16x128xf32>
    %cst_8 = arith.constant dense<0xFF800000> : vector<128xf32>
    %23 = vector.multi_reduction <maximumf>, %22, %cst_8 [0] : vector<16x128xf32> to vector<128xf32>
    %24 = vector.shape_cast %23 : vector<128xf32> to vector<1x128xf32>
    %c1_i32 = arith.constant 1 : i32
    %25 = vector.broadcast %c1_i32 : i32 to vector<16x1xi32>
    %26 = arith.cmpi eq, %16, %25 : vector<16x1xi32>
    %cst_9 = arith.constant 0xFF800000 : f32
    %27 = vector.shape_cast %26 : vector<16x1xi1> to vector<16x1xi1>
    %28 = vector.broadcast %27 : vector<16x1xi1> to vector<16x128xi1>
    %29 = vector.broadcast %cst_9 : f32 to vector<16x128xf32>
    %30 = arith.select %28, %15, %29 : vector<16x128xi1>, vector<16x128xf32>
    %cst_10 = arith.constant dense<0xFF800000> : vector<128xf32>
    %31 = vector.multi_reduction <maximumf>, %30, %cst_10 [0] : vector<16x128xf32> to vector<128xf32>
    %32 = vector.shape_cast %31 : vector<128xf32> to vector<1x128xf32>
    %33 = tpu.concatenate %24, %32 in 0 : vector<1x128xf32>, vector<1x128xf32> -> vector<2x128xf32>
    %c0_11 = arith.constant 0 : index
    %c0_12 = arith.constant 0 : index
    %34 = vector.load %arg3[%c0_11, %c0_12] : memref<128x128xf32, #tpu.memory_space<vmem>>, vector<128x128xf32>
    %cst_13 = arith.constant dense<0.000000e+00> : vector<2x128xf32>
    %35 = tpu.matmul %33, %34, %cst_13 {dimension_numbers = #tpu.dot_dimension_numbers<[1], [0], [0], [1], [0, 0, 1, 1], [], []>} : vector<2x128xf32>, vector<128x128xf32>, vector<2x128xf32> -> vector<2x128xf32>
    %c0_14 = arith.constant 0 : index
    %c0_15 = arith.constant 0 : index
    %36 = vector.load %arg4[%c0_14, %c0_15] : memref<2x128xf32, #tpu.memory_space<vmem>>, vector<2x128xf32>
    tpu.vector_store %arg4[%c0_14, %c0_15], %35 {strides = array<i32>} : memref<2x128xf32, #tpu.memory_space<vmem>>, vector<2x128xf32>,
    return
  }
}

</mosaic_0001>

<bundles_post_ra>
// kernel: tpu_custom_call.1
= control target key start
LH: loop header
LB: loop body
LE: loop exit
PB: predicated region body
PF: predicated region fallthrough
CT: control target
= control target key end

     0   :  { %9 = vsyncpa [#allocation3], 0  ;;  %s322_s0 = inlined_call_operand.vmem [shape: s32[16,1], index: 0, kind: input, shape index: {}]   ;;  %s323_s1 = inlined_call_operand.vmem [shape: f32[16,128], index: 1, kind: input, shape index: {}]   ;;  %s324_s2 = inlined_call_operand.vmem [shape: f32[1,128], index: 2, kind: input, shape index: {}]   ;;  %s325_s3 = inlined_call_operand.hbm [shape: f32[128,128], index: 3, kind: input, shape index: {}]   ;;  %s326_s4 = inlined_call_operand.hbm [shape: f32[2,128], index: 4, kind: output, shape index: {}]  }
   0x1   :  { %10 = vsyncpa [#allocation4], 0  ;;  %s21_s17 = sshll.u32 %s325_s3, 4  ;;  %s261_s18 = smov [#allocation2]   ;;  %s22_s17 = int_to_ptr.hbm [resolvable:$true] %s21_s17 }
   0x2   :  { %s23_s19 = sshll.u32 %s261_s18, 4  ;;  %s262_s20 = smov 128   ;;  %s24_s19 = int_to_ptr.vmem [resolvable:$true] %s23_s19 }
   0x3   :  { %s263_s21 = smov 8  }
   0x4   :  { %29 = dma.hbm_to_vmem [thread:$0]  %s22_s17, 2048, %s24_s19, [#allocation3], %s262_s20, %s262_s20, %s263_s21  }
   0x5   :  { %257 = dma.done.wait [#allocation3], 2048  }
   0x6   :  { %258 = vsyncadd [#allocation3], 4294965248  ;;  %v264_v0 = vmov 0   ;;  %v297_v1 = vld [vmem:[%s323_s1] sm:$0xff]  ;;  %v91_v6 = vld [vmem:[%s322_s0 + $0x8] sm:$0xff]  ;;  %s180_s6 = sshll.u32 %s326_s4, 4  ;;  %s181_s6 = int_to_ptr.hbm [resolvable:$true] %s180_s6 }
   0x7   :  { %197 = vset.pattern.permute.xlu1 %v264_v0  ;;  %198 = vset.pattern.permute.xlu2 %v264_v0  ;;  %v200_v2 = vld [vmem:[%s324_s2] ss:$0 sm:$0xff]  ;;  %v312_v8 = vld [vmem:[%s323_s1 + $0x8] sm:$0xff]  ;;  %vm93_vm2 = vcmp.eq.s32.totalorder %v91_v6, 0  ;;  %vm114_vm3 = vcmp.eq.s32.totalorder %v91_v6, 1  ;;  %v151_v12 = vld [vmem:[#allocation2 + $0x78] sm:$0xff] }
   0x8   :  { %199 = vset.pattern.permute.xlu0 %v264_v0  ;;  %v90_v3 = vld [vmem:[%s322_s0] sm:$0xff]  ;;  %v40_v4 = vmul.f32 %v200_v2, %v297_v1  ;;  %v41_v9 = vmul.f32 %v200_v2, %v312_v8  ;;  %v95_v10 = vsel %vm93_vm2, 1, %v264_v0  ;;  %v116_v11 = vsel %vm114_vm3, 1, %v264_v0  ;;  %152 = vmatpush.msra.mxu0 %v151_v12  ;;  %v150_v13 = vld [vmem:[#allocation2 + $0x70] sm:$0xff]  ;;  %v149_v14 = vld [vmem:[#allocation2 + $0x68] sm:$0xff]  ;;  %s265_s0 = smov [#allocation5]  }
   0x9   :  { %vm92_vm0 = vcmp.eq.s32.totalorder %v90_v3, 0  ;;  %vm113_vm1 = vcmp.eq.s32.totalorder %v90_v3, 1  ;;  %v148_v17 = vld [vmem:[#allocation2 + $0x60] sm:$0xff]  ;;  %v147_v18 = vld [vmem:[#allocation2 + $0x58] sm:$0xff]  ;;  %v146_v19 = vld [vmem:[#allocation2 + $0x50] sm:$0xff]  ;;  %s178_s1 = sshll.u32 %s265_s0, 4  ;;  %s179_s1 = int_to_ptr.vmem [resolvable:$true] %s178_s1 }
   0xa   :  { %v94_v5 = vsel %vm92_vm0, 1, %v264_v0  ;;  %42 = vadd.xlane.f32.xlu0 %v40_v4  ;;  %v115_v7 = vsel %vm113_vm1, 1, %v264_v0  ;;  %153 = vmatpush.msra.mxu0 %v150_v13  ;;  %v145_v20 = vld [vmem:[#allocation2 + $0x48] sm:$0xff]  ;;  %v144_v24 = vld [vmem:[#allocation2 + $0x40] sm:$0xff]  ;;  %v143_v26 = vld [vmem:[#allocation2 + $0x38] sm:$0xff]  ;;  %vm134_vm0 = vcmask 1040384  }
   0xb   :  { %97 = vperm.xlu1 %197, %v94_v5   ;;  %118 = vperm.xlu2 %198, %v115_v7   ;;  %v142_v27 = vld [vmem:[#allocation2 + $0x30] sm:$0xff]  ;;  %v141_v28 = vld [vmem:[#allocation2 + $0x28] sm:$0xff]  ;;  %v140_v30 = vld [vmem:[#allocation2 + $0x20] sm:$0xff] }
   0xc   :  { %154 = vmatpush.msra.mxu0 %v149_v14  ;;  %v139_v34 = vld [vmem:[#allocation2 + $0x18] sm:$0xff]  ;;  %v138_v35 = vld [vmem:[#allocation2 + $0x10] sm:$0xff]  ;;  %v137_v37 = vld [vmem:[#allocation2 + $0x8] sm:$0xff] }
   0xd   :  { %v136_v41 = vld [vmem:[#allocation2] sm:$0xff] }
   0xe   :  { %155 = vmatpush.msra.mxu0 %v148_v17 }
  0x10   :  { %156 = vmatpush.msra.mxu0 %v147_v18 }
  0x12   :  { %44 = vadd.xlane.f32.xlu0 %v41_v9  ;;  %157 = vmatpush.msra.mxu0 %v146_v19 }
  0x13   :  { %100 = vperm.xlu1 %197, %v95_v10   ;;  %121 = vperm.xlu2 %198, %v116_v11  }
  0x14   :  { %158 = vmatpush.msra.mxu0 %v145_v20 }
  0x16   :  { %159 = vmatpush.msra.mxu0 %v144_v24 }
  0x18   :  { %160 = vmatpush.msra.mxu0 %v143_v26 }
  0x1a   :  { %161 = vmatpush.msra.mxu0 %v142_v27 }
  0x1c   :  { %162 = vmatpush.msra.mxu0 %v141_v28 }
  0x1e   :  { %163 = vmatpush.msra.mxu0 %v140_v30 }
  0x20   :  { %164 = vmatpush.msra.mxu0 %v139_v34 }
  0x22   :  { %165 = vmatpush.msra.mxu0 %v138_v35 }
  0x24   :  { %166 = vmatpush.msra.mxu0 %v137_v37 }
  0x26   :  { %167 = vmatpush.msra.mxu0 %v136_v41 }
  0x65   :  { %v119_v49 = vpop.permute.xlu2 %118 }
  0x66   :  { %vm123_vm12 = vcmp.eq.s32.totalorder %v119_v49, 1 }
  0x6d   :  { %v122_v62 = vpop.permute.xlu2 %121 }
  0x6e   :  { %vm124_vm14 = vcmp.eq.s32.totalorder %v122_v62, 1 }
  0x7d   :  { %v43_v15 = vpop.xlane.xlu0 %42  ;;  %v98_v50 = vpop.permute.xlu1 %97 }
  0x7e   :  { %v190_v16 = vmul.f32 -1.442695, %v43_v15  ;;  %vm102_vm13 = vcmp.eq.s32.totalorder %v98_v50, 1 }
  0x80   :  { %201 = vpow2.f32 %v190_v16 }
  0x85   :  { %v45_v21 = vpop.xlane.xlu0 %44  ;;  %v101_v0 = vpop.permute.xlu1 %100 }
  0x86   :  { %v202_v22 = vpop.eup %201  ;;  %v191_v23 = vmul.f32 -1.442695, %v45_v21  ;;  %vm103_vm15 = vcmp.eq.s32.totalorder %v101_v0, 1 }
  0x87   :  { %v52_v25 = vadd.f32 1.0, %v202_v22 }
  0x88   :  { %203 = vpow2.f32 %v191_v23 }
  0x89   :  { %205 = vrcp.f32 %v52_v25  ;;  %v65_v38 = vand.u32 2147483648, %v52_v25  ;;  %v63_v40 = vand.u32 2147483647, %v52_v25  ;;  %vm59_vm5 = vweird.f32 %v52_v25 }
  0x8b   :  { %v66_v44 = vor.u32 1.1754944e-38, %v65_v38  ;;  %vm64_vm7 = vcmp.eq.f32.partialorder %v63_v40, 8.507059e+37 }
  0x8e   :  { %v204_v29 = vpop.eup %203 }
  0x8f   :  { %v206_v31 = vpop.eup %205  ;;  %v53_v32 = vadd.f32 1.0, %v204_v29 }
  0x90   :  { %v55_v33 = vmul.f32 %v206_v31, %v52_v25  ;;  %vm60_vm4 = vweird.f32 %v206_v31 }
  0x91   :  { %207 = vrcp.f32 %v53_v32  ;;  %vm61_vm6 = vmor %vm59_vm5, %vm60_vm4  ;;  %v80_v51 = vand.u32 2147483648, %v53_v32  ;;  %v78_v54 = vand.u32 2147483647, %v53_v32  ;;  %vm74_vm9 = vweird.f32 %v53_v32 }
  0x92   :  { %v56_v36 = vsub.f32 1.0, %v55_v33 }
  0x93   :  { %v81_v56 = vor.u32 1.1754944e-38, %v80_v51  ;;  %vm79_vm11 = vcmp.eq.f32.partialorder %v78_v54, 8.507059e+37 }
  0x94   :  { %v57_v39 = vmul.f32 %v206_v31, %v56_v36 }
  0x96   :  { %v58_v42 = vadd.f32 %v206_v31, %v57_v39 }
  0x97   :  { %v208_v43 = vpop.eup %207 }
  0x98   :  { %v70_v45 = vmul.f32 %v208_v43, %v53_v32  ;;  %v62_v46 = vsel %vm61_vm6, %v206_v31, %v58_v42  ;;  %vm75_vm8 = vweird.f32 %v208_v43 }
  0x99   :  { %v67_v47 = vsel %vm64_vm7, %v66_v44, %v62_v46  ;;  %vm76_vm10 = vmor %vm74_vm9, %vm75_vm8 }
  0x9a   :  { %v71_v48 = vsub.f32 1.0, %v70_v45  ;;  %v84_v52 = vmul.f32 %v67_v47, %v297_v1 }
  0x9c   :  { %v72_v53 = vmul.f32 %v208_v43, %v71_v48  ;;  %v86_v57 = vadd.f32 %v84_v52, %v297_v1 }
  0x9e   :  { %v73_v55 = vadd.f32 %v208_v43, %v72_v53  ;;  %v88_v61 = vmul.f32 0.5, %v86_v57 }
  0xa0   :  { %v77_v58 = vsel %vm76_vm10, %v208_v43, %v73_v55  ;;  %v125_v3 = vsel %vm123_vm12, %v88_v61, -inf  ;;  %v104_v4 = vsel %vm102_vm13, %v88_v61, -inf }
  0xa1   :  { %v82_v59 = vsel %vm79_vm11, %v81_v56, %v77_v58 }
  0xa2   :  { %v85_v60 = vmul.f32 %v82_v59, %v312_v8 }
  0xa4   :  { %v87_v63 = vadd.f32 %v85_v60, %v312_v8 }
  0xa6   :  { %v89_v2 = vmul.f32 0.5, %v87_v63 }
  0xa8   :  { %v126_v5 = vsel %vm124_vm14, %v89_v2, -inf  ;;  %v105_v6 = vsel %vm103_vm15, %v89_v2, -inf }
  0xa9   :  { %v127_v1 = vmax.f32 %v125_v3, %v126_v5  ;;  %v106_v7 = vmax.f32 %v104_v4, %v105_v6 }
  0xab   :  { %v128_v9 = vrot.slane %v127_v1, 4  ;;  %v107_v10 = vrot.slane %v106_v7, 4 }
  0xad   :  { %v129_v11 = vmax.f32 %v127_v1, %v128_v9  ;;  %v108_v12 = vmax.f32 %v106_v7, %v107_v10 }
  0xaf   :  { %v130_v13 = vrot.slane %v129_v11, 2  ;;  %v109_v14 = vrot.slane %v108_v12, 2 }
  0xb1   :  { %v131_v15 = vmax.f32 %v129_v11, %v130_v13  ;;  %v110_v8 = vmax.f32 %v108_v12, %v109_v14 }
  0xb3   :  { %v111_v16 = vrot.slane %v110_v8, 1  ;;  %v132_v17 = vrot.slane %v131_v15, 1 }
  0xb5   :  { %v112_v18 = vmax.f32 %v110_v8, %v111_v16  ;;  %v133_v19 = vmax.f32 %v131_v15, %v132_v17 }
  0xb7   :  { %v135_v20 = vsel %vm134_vm0, %v112_v18, %v133_v19 }
  0xb8   :  { %168 = vmatmul.f32.vlgmr.msra.gmra.mxu0 %v135_v20 }
 0x135   :  { %v169_v21 = vpop.f32.mrf.mxu0 }
 0x136   :  { %172 = vst [vmem:[#allocation5] sm:$0x3] %v169_v21 }
 0x137   :  { %183 = dma.vmem_to_hbm [thread:$0]  %s179_s1, 32, %s181_s6, [#allocation4]  }
 0x138   :  { %259 = dma.done.wait [#allocation4], 32  }
 0x139   :  { %260 = vsyncadd [#allocation4], 4294967264 }
 0x13a   :  { %188 = vsyncpa [#allocation3], 1 }
 0x13b   :  { %189 = vsyncpa [#allocation4], 1 }

</bundles_post_ra>
